<compile_context>
chip_gen: v5e
topology: v5e:2x2
jax: 0.10.0
libtpu: 0.0.40
codegen_flags: <defaults>
</compile_context>

<pallas_src>
import math

import jax
import jax.numpy as jnp
from jax.experimental import pallas as pl
from jax.experimental.pallas import tpu as pltpu


# Non-center depthwise-3x3 tap offsets; row m of the precomputed mask input
# corresponds to _NEIGHBOR_OFFSETS[m].
_NEIGHBOR_OFFSETS = ((-1, -1), (-1, 0), (-1, 1),
                     (0, -1),           (0, 1),
                     (1, -1),  (1, 0),  (1, 1))


def _mish(x):
    # mish(x) = x * tanh(softplus(x)) = x * n / (n + 2),  n = e^x * (e^x + 2)
    # One EUP exp + one approx EUP reciprocal; everything else stays on the VPU.
    t = jnp.exp(jnp.minimum(x, 20.0))        # for x > 20, mish(x) == x in f32
    n = t * (t + 2.0)
    return x * n * pl.reciprocal(n + 2.0, approx=True)


def _make_kernel(H, W, k_eca, use_residual):
    HW = H * W
    pad = (k_eca - 1) // 2

    def kernel(eca_ref, x_ref, w1_ref, b1_ref, dw_ref, b2_ref,
               w3_ref, b3_ref, mask_ref, o_ref):
        hidden = w1_ref.shape[0]

        x = x_ref[0]                                             # (Cin, HW) bf16

        # ---- 1x1 expand conv (BN1 folded): bf16 MXU matmul, f32 accumulate ----
        h = jnp.dot(w1_ref[...], x, preferred_element_type=jnp.float32)
        h = _mish(h + b1_ref[...])                               # (hidden, HW) f32

        # ---- depthwise 3x3, stride=1, pad=1: lane rolls * precomputed masks ----
        # TODO(synk): stride>1 depthwise conv not implemented (wrapper asserts).
        masks = mask_ref[...]                                    # (8, HW) f32
        # center tap with BN2 bias fused into the first accumulate
        acc = h * dw_ref[:, 4:5] + b2_ref[...]
        for m, (dh, dwp) in enumerate(_NEIGHBOR_OFFSETS):
            sh = (-(dh * W + dwp)) % HW
            shifted = pltpu.roll(h, sh, axis=1)                  # XLU, off VALU path
            idx = (dh + 1) * 3 + (dwp + 1)
            acc = acc + (shifted * masks[m:m + 1, :]) * dw_ref[:, idx:idx + 1]
        h2 = _mish(acc)                                          # (hidden, HW) f32

        # ---- ECA: per-sample global avg pool -> k-tap conv over channels ----
        avg = jnp.mean(h2, axis=1, keepdims=True)                # (hidden, 1)
        cidx = jax.lax.broadcasted_iota(jnp.int32, (hidden, 1), 0)
        conv = jnp.zeros((hidden, 1), jnp.float32)
        for i in range(k_eca):
            off = i - pad
            sh = (-off) % hidden
            shifted = avg if sh == 0 else pltpu.roll(avg, sh, axis=0)
            if off != 0:
                valid = (cidx + off >= 0) & (cidx + off < hidden)
                shifted = jnp.where(valid, shifted, 0.0)
            conv = conv + shifted * eca_ref[i]
        gate = jax.nn.sigmoid(conv)                              # (hidden, 1)

        # ---- 1x1 project conv (BN3 folded): bf16 MXU matmul ----
        h3 = (h2 * gate).astype(jnp.bfloat16)
        out = jnp.dot(w3_ref[...], h3, preferred_element_type=jnp.float32)
        out = out + b3_ref[...]                                  # (Cout, HW)

        # ---- residual (DropPath == identity in eval / inference mode) ----
        if use_residual:
            out = out + x.astype(jnp.float32)
        o_ref[0] = out

    return kernel


def mbconv_forward(x_nchw, params, use_residual, stride=1):
    # Correctness guard from review: stride>1 depthwise is not implemented.
    assert stride == 1, "MBConv Pallas kernel only supports stride=1"

    B, Cin, H, W = x_nchw.shape
    HW = H * W
    # NCHW -> (B, C, H*W) is a free reshape; cast input to bf16 for the MXU.
    x = x_nchw.reshape(B, Cin, HW).astype(jnp.bfloat16)

    # Fold eval-mode BatchNorm scales into the conv weights (bf16 for the MXU);
    # keep per-channel biases and depthwise taps in f32 (VPU path).
    w1 = (params["w1"] * params["s1"][:, None]).astype(jnp.bfloat16)  # (hidden, Cin)
    b1 = params["b1"][:, None].astype(jnp.float32)                    # (hidden, 1)
    dw = (params["dw"] * params["s2"][:, None]).astype(jnp.float32)   # (hidden, 9)
    b2 = params["b2"][:, None].astype(jnp.float32)                    # (hidden, 1)
    w3 = (params["w3"] * params["s3"][:, None]).astype(jnp.bfloat16)  # (Cout, hidden)
    b3 = params["b3"][:, None].astype(jnp.float32)                    # (Cout, 1)
    eca = params["eca"].astype(jnp.float32)                           # (k,)

    hidden = w1.shape[0]
    Cout = w3.shape[0]
    k_eca = eca.shape[0]

    # Precompute the 8 non-center depthwise boundary masks once (f32 multiplies
    # in-kernel instead of per-tap iota/div/mod/compare/where).
    rows = jnp.arange(HW, dtype=jnp.int32) // W
    cols = jnp.arange(HW, dtype=jnp.int32) % W
    mask_rows = []
    for dh, dwp in _NEIGHBOR_OFFSETS:
        valid = ((rows + dh >= 0) & (rows + dh < H) &
                 (cols + dwp >= 0) & (cols + dwp < W))
        mask_rows.append(valid.astype(jnp.float32))
    masks = jnp.stack(mask_rows, axis=0)                              # (8, HW)

    # TODO(synk): for production H*W / hidden sizes, add a spatial grid axis over
    # row-bands (rows*W a multiple of 128, 1-row halo) with an ECA-aware
    # cross-tile (hidden,1) pooling accumulator on a trailing "arbitrary" axis;
    # for tiny B*HW, fold B into the lane axis to amortize per-step overhead.
    kernel = _make_kernel(H, W, k_eca, use_residual)
    out = pl.pallas_call(
        kernel,
        out_shape=jax.ShapeDtypeStruct((B, Cout, HW), jnp.float32),
        grid_spec=pltpu.PrefetchScalarGridSpec(
            num_scalar_prefetch=0,
            grid=(B,),  # per-sample steps keep ECA's global pool exact
            in_specs=[
                pl.BlockSpec(memory_space=pltpu.MemorySpace.SMEM),    # eca taps
                pl.BlockSpec((1, Cin, HW), lambda b: (b, 0, 0)),       # x (bf16)
                pl.BlockSpec((hidden, Cin), lambda b: (0, 0)),         # w1 (BN1 folded)
                pl.BlockSpec((hidden, 1), lambda b: (0, 0)),           # b1
                pl.BlockSpec((hidden, 9), lambda b: (0, 0)),           # dw (BN2 folded)
                pl.BlockSpec((hidden, 1), lambda b: (0, 0)),           # b2
                pl.BlockSpec((Cout, hidden), lambda b: (0, 0)),        # w3 (BN3 folded)
                pl.BlockSpec((Cout, 1), lambda b: (0, 0)),             # b3
                pl.BlockSpec((8, HW), lambda b: (0, 0)),               # boundary masks
            ],
            out_specs=pl.BlockSpec((1, Cout, HW), lambda b: (b, 0, 0)),
        ),
        compiler_params=pltpu.CompilerParams(
            dimension_semantics=("parallel",),
            vmem_limit_bytes=48 * 1024 * 1024),   # above default scoped, < v7x 64 MiB
    )(eca, x, w1, b1, dw, b2, w3, b3, masks)
    return out.reshape(B, Cout, H, W)


def _bn_fold(key, c, eps=1e-5):
    k1, k2, k3, k4 = jax.random.split(key, 4)
    gamma = 1.0 + 0.1 * jax.random.normal(k1, (c,), jnp.float32)
    beta = 0.1 * jax.random.normal(k2, (c,), jnp.float32)
    mean = 0.1 * jax.random.normal(k3, (c,), jnp.float32)
    var = 0.5 + jnp.abs(jax.random.normal(k4, (c,), jnp.float32))
    scale = gamma / jnp.sqrt(var + eps)
    bias = beta - mean * scale
    return scale, bias


def init_params(key, in_channels, out_channels, expansion=4):
    hidden = in_channels * expansion
    keys = jax.random.split(key, 8)

    # expand 1x1: torch (hidden, in, 1, 1) -> here (hidden, in)
    w1 = 0.2 * jax.random.normal(keys[0], (hidden, in_channels), jnp.float32)
    s1, b1 = _bn_fold(keys[1], hidden)

    # depthwise 3x3: torch (hidden, 1, 3, 3) -> here (hidden, 9), tap idx = kh*3+kw
    dw = 0.2 * jax.random.normal(keys[2], (hidden, 9), jnp.float32)
    s2, b2 = _bn_fold(keys[3], hidden)

    # ECA 1D conv kernel size, same formula as the PyTorch module
    t = int(abs((math.log(hidden, 2) + 1) / 2))
    k = t if t % 2 else t + 1
    eca = 0.5 * jax.random.normal(keys[4], (k,), jnp.float32)

    # project 1x1: torch (out, hidden, 1, 1) -> here (out, hidden)
    w3 = 0.2 * jax.random.normal(keys[5], (out_channels, hidden), jnp.float32)
    s3, b3 = _bn_fold(keys[6], out_channels)

    return {"w1": w1, "s1": s1, "b1": b1,
            "dw": dw, "s2": s2, "b2": b2,
            "eca": eca,
            "w3": w3, "s3": s3, "b3": b3}


if __name__ == "__main__":
    key = jax.random.PRNGKey(0)
    kp, kx = jax.random.split(key)

    B, in_c, out_c, H, W = 2, 4, 4, 16, 16
    stride = 1
    use_residual = (in_c == out_c) and (stride == 1)

    params = init_params(kp, in_c, out_c, expansion=4)
    x = jax.random.normal(kx, (B, in_c, H, W), jnp.float32)

    y = mbconv_forward(x, params, use_residual, stride=stride)
    jax.block_until_ready(y)
    assert y.shape == (B, out_c, H, W)
    print("KERNEL_OK")
</pallas_src>

<mosaic_0001>
module attributes {stable_mosaic.version = 11 : i64} {
  func.func @kernel(%arg0: i32, %arg1: memref<3xf32, #tpu.memory_space<smem>>, %arg2: memref<1x4x256xbf16, #tpu.memory_space<vmem>>, %arg3: memref<16x4xbf16, #tpu.memory_space<vmem>>, %arg4: memref<16x1xf32, #tpu.memory_space<vmem>>, %arg5: memref<16x9xf32, #tpu.memory_space<vmem>>, %arg6: memref<16x1xf32, #tpu.memory_space<vmem>>, %arg7: memref<4x16xbf16, #tpu.memory_space<vmem>>, %arg8: memref<4x1xf32, #tpu.memory_space<vmem>>, %arg9: memref<8x256xf32, #tpu.memory_space<vmem>>, %arg10: memref<1x4x256xf32, #tpu.memory_space<vmem>>) attributes {dimension_semantics = [#tpu.dimension_semantics<parallel>], iteration_bounds = array<i64: 2>, scalar_prefetch = 0 : i64, scratch_operands = 0 : i64, tpu.core_type = #tpu.core_type<tc>, window_params = [{transform_indices = @transform_0, window_bounds = array<i64: 3>}, {transform_indices = @transform_1, window_bounds = array<i64: 1, 4, 256>}, {pipeline_mode = #tpu.pipeline_mode<synchronous>, transform_indices = @transform_2, window_bounds = array<i64: 16, 4>}, {pipeline_mode = #tpu.pipeline_mode<synchronous>, transform_indices = @transform_3, window_bounds = array<i64: 16, 1>}, {pipeline_mode = #tpu.pipeline_mode<synchronous>, transform_indices = @transform_4, window_bounds = array<i64: 16, 9>}, {pipeline_mode = #tpu.pipeline_mode<synchronous>, transform_indices = @transform_5, window_bounds = array<i64: 16, 1>}, {pipeline_mode = #tpu.pipeline_mode<synchronous>, transform_indices = @transform_6, window_bounds = array<i64: 4, 16>}, {pipeline_mode = #tpu.pipeline_mode<synchronous>, transform_indices = @transform_7, window_bounds = array<i64: 4, 1>}, {pipeline_mode = #tpu.pipeline_mode<synchronous>, transform_indices = @transform_8, window_bounds = array<i64: 8, 256>}, {transform_indices = @transform_9, window_bounds = array<i64: 1, 4, 256>}]} {
    %c0 = arith.constant 0 : index
    %c0_0 = arith.constant 0 : index
    %c0_1 = arith.constant 0 : index
    %0 = vector.load %arg2[%c0, %c0_0, %c0_1] : memref<1x4x256xbf16, #tpu.memory_space<vmem>>, vector<1x4x256xbf16>
    %1 = vector.shape_cast %0 : vector<1x4x256xbf16> to vector<4x256xbf16>
    %c0_2 = arith.constant 0 : index
    %c0_3 = arith.constant 0 : index
    %2 = vector.load %arg3[%c0_2, %c0_3] : memref<16x4xbf16, #tpu.memory_space<vmem>>, vector<16x4xbf16>
    %cst = arith.constant dense<0.000000e+00> : vector<16x256xf32>
    %3 = tpu.matmul %2, %1, %cst {dimension_numbers = #tpu.dot_dimension_numbers<[1], [0], [0], [1], [0, 0, 1, 1], [], []>} : vector<16x4xbf16>, vector<4x256xbf16>, vector<16x256xf32> -> vector<16x256xf32>
    %c0_4 = arith.constant 0 : index
    %c0_5 = arith.constant 0 : index
    %4 = vector.load %arg4[%c0_4, %c0_5] : memref<16x1xf32, #tpu.memory_space<vmem>>, vector<16x1xf32>
    %5 = vector.broadcast %4 : vector<16x1xf32> to vector<16x256xf32>
    %6 = arith.addf %3, %5 : vector<16x256xf32>
    %cst_6 = arith.constant 2.000000e+01 : f32
    %7 = vector.broadcast %cst_6 : f32 to vector<16x256xf32>
    %8 = arith.minimumf %6, %7 : vector<16x256xf32>
    %9 = math.exp %8 : vector<16x256xf32>
    %cst_7 = arith.constant 2.000000e+00 : f32
    %10 = vector.broadcast %cst_7 : f32 to vector<16x256xf32>
    %11 = arith.addf %9, %10 : vector<16x256xf32>
    %12 = arith.mulf %9, %11 : vector<16x256xf32>
    %13 = arith.mulf %6, %12 : vector<16x256xf32>
    %cst_8 = arith.constant 2.000000e+00 : f32
    %14 = vector.broadcast %cst_8 : f32 to vector<16x256xf32>
    %15 = arith.addf %12, %14 : vector<16x256xf32>
    %16 = tpu.reciprocal %15 {approx = true} : vector<16x256xf32> -> vector<16x256xf32>
    %17 = arith.mulf %13, %16 : vector<16x256xf32>
    %c0_9 = arith.constant 0 : index
    %c0_10 = arith.constant 0 : index
    %18 = vector.load %arg9[%c0_9, %c0_10] : memref<8x256xf32, #tpu.memory_space<vmem>>, vector<8x256xf32>
    %c0_11 = arith.constant 0 : index
    %c4 = arith.constant 4 : index
    %19 = vector.load %arg5[%c0_11, %c4] : memref<16x9xf32, #tpu.memory_space<vmem>>, vector<16x1xf32>
    %20 = vector.broadcast %19 : vector<16x1xf32> to vector<16x256xf32>
    %21 = arith.mulf %17, %20 : vector<16x256xf32>
    %c0_12 = arith.constant 0 : index
    %c0_13 = arith.constant 0 : index
    %22 = vector.load %arg6[%c0_12, %c0_13] : memref<16x1xf32, #tpu.memory_space<vmem>>, vector<16x1xf32>
    %23 = vector.broadcast %22 : vector<16x1xf32> to vector<16x256xf32>
    %24 = arith.addf %21, %23 : vector<16x256xf32>
    %c17_i32 = arith.constant 17 : i32
    %25 = tpu.dynamic_rotate %17 by %c17_i32 dim 1 : vector<16x256xf32>, i32 -> vector<16x256xf32>
    %26 = vector.extract_strided_slice %18 {offsets = [0, 0], sizes = [1, 256], strides = [1, 1]} : vector<8x256xf32> to vector<1x256xf32>
    %27 = vector.broadcast %26 : vector<1x256xf32> to vector<16x256xf32>
    %28 = arith.mulf %25, %27 : vector<16x256xf32>
    %c0_14 = arith.constant 0 : index
    %c0_15 = arith.constant 0 : index
    %29 = vector.load %arg5[%c0_14, %c0_15] : memref<16x9xf32, #tpu.memory_space<vmem>>, vector<16x1xf32>
    %30 = vector.broadcast %29 : vector<16x1xf32> to vector<16x256xf32>
    %31 = arith.mulf %28, %30 : vector<16x256xf32>
    %32 = arith.addf %24, %31 : vector<16x256xf32>
    %c16_i32 = arith.constant 16 : i32
    %33 = tpu.dynamic_rotate %17 by %c16_i32 dim 1 : vector<16x256xf32>, i32 -> vector<16x256xf32>
    %34 = vector.extract_strided_slice %18 {offsets = [1, 0], sizes = [1, 256], strides = [1, 1]} : vector<8x256xf32> to vector<1x256xf32>
    %35 = vector.broadcast %34 : vector<1x256xf32> to vector<16x256xf32>
    %36 = arith.mulf %33, %35 : vector<16x256xf32>
    %c0_16 = arith.constant 0 : index
    %c1 = arith.constant 1 : index
    %37 = vector.load %arg5[%c0_16, %c1] : memref<16x9xf32, #tpu.memory_space<vmem>>, vector<16x1xf32>
    %38 = vector.broadcast %37 : vector<16x1xf32> to vector<16x256xf32>
    %39 = arith.mulf %36, %38 : vector<16x256xf32>
    %40 = arith.addf %32, %39 : vector<16x256xf32>
    %c15_i32 = arith.constant 15 : i32
    %41 = tpu.dynamic_rotate %17 by %c15_i32 dim 1 : vector<16x256xf32>, i32 -> vector<16x256xf32>
    %42 = vector.extract_strided_slice %18 {offsets = [2, 0], sizes = [1, 256], strides = [1, 1]} : vector<8x256xf32> to vector<1x256xf32>
    %43 = vector.broadcast %42 : vector<1x256xf32> to vector<16x256xf32>
    %44 = arith.mulf %41, %43 : vector<16x256xf32>
    %c0_17 = arith.constant 0 : index
    %c2 = arith.constant 2 : index
    %45 = vector.load %arg5[%c0_17, %c2] : memref<16x9xf32, #tpu.memory_space<vmem>>, vector<16x1xf32>
    %46 = vector.broadcast %45 : vector<16x1xf32> to vector<16x256xf32>
    %47 = arith.mulf %44, %46 : vector<16x256xf32>
    %48 = arith.addf %40, %47 : vector<16x256xf32>
    %c1_i32 = arith.constant 1 : i32
    %49 = tpu.dynamic_rotate %17 by %c1_i32 dim 1 : vector<16x256xf32>, i32 -> vector<16x256xf32>
    %50 = vector.extract_strided_slice %18 {offsets = [3, 0], sizes = [1, 256], strides = [1, 1]} : vector<8x256xf32> to vector<1x256xf32>
    %51 = vector.broadcast %50 : vector<1x256xf32> to vector<16x256xf32>
    %52 = arith.mulf %49, %51 : vector<16x256xf32>
    %c0_18 = arith.constant 0 : index
    %c3 = arith.constant 3 : index
    %53 = vector.load %arg5[%c0_18, %c3] : memref<16x9xf32, #tpu.memory_space<vmem>>, vector<16x1xf32>
    %54 = vector.broadcast %53 : vector<16x1xf32> to vector<16x256xf32>
    %55 = arith.mulf %52, %54 : vector<16x256xf32>
    %56 = arith.addf %48, %55 : vector<16x256xf32>
    %c255_i32 = arith.constant 255 : i32
    %57 = tpu.dynamic_rotate %17 by %c255_i32 dim 1 : vector<16x256xf32>, i32 -> vector<16x256xf32>
    %58 = vector.extract_strided_slice %18 {offsets = [4, 0], sizes = [1, 256], strides = [1, 1]} : vector<8x256xf32> to vector<1x256xf32>
    %59 = vector.broadcast %58 : vector<1x256xf32> to vector<16x256xf32>
    %60 = arith.mulf %57, %59 : vector<16x256xf32>
    %c0_19 = arith.constant 0 : index
    %c5 = arith.constant 5 : index
    %61 = vector.load %arg5[%c0_19, %c5] : memref<16x9xf32, #tpu.memory_space<vmem>>, vector<16x1xf32>
    %62 = vector.broadcast %61 : vector<16x1xf32> to vector<16x256xf32>
    %63 = arith.mulf %60, %62 : vector<16x256xf32>
    %64 = arith.addf %56, %63 : vector<16x256xf32>
    %c241_i32 = arith.constant 241 : i32
    %65 = tpu.dynamic_rotate %17 by %c241_i32 dim 1 : vector<16x256xf32>, i32 -> vector<16x256xf32>
    %66 = vector.extract_strided_slice %18 {offsets = [5, 0], sizes = [1, 256], strides = [1, 1]} : vector<8x256xf32> to vector<1x256xf32>
    %67 = vector.broadcast %66 : vector<1x256xf32> to vector<16x256xf32>
    %68 = arith.mulf %65, %67 : vector<16x256xf32>
    %c0_20 = arith.constant 0 : index
    %c6 = arith.constant 6 : index
    %69 = vector.load %arg5[%c0_20, %c6] : memref<16x9xf32, #tpu.memory_space<vmem>>, vector<16x1xf32>
    %70 = vector.broadcast %69 : vector<16x1xf32> to vector<16x256xf32>
    %71 = arith.mulf %68, %70 : vector<16x256xf32>
    %72 = arith.addf %64, %71 : vector<16x256xf32>
    %c240_i32 = arith.constant 240 : i32
    %73 = tpu.dynamic_rotate %17 by %c240_i32 dim 1 : vector<16x256xf32>, i32 -> vector<16x256xf32>
    %74 = vector.extract_strided_slice %18 {offsets = [6, 0], sizes = [1, 256], strides = [1, 1]} : vector<8x256xf32> to vector<1x256xf32>
    %75 = vector.broadcast %74 : vector<1x256xf32> to vector<16x256xf32>
    %76 = arith.mulf %73, %75 : vector<16x256xf32>
    %c0_21 = arith.constant 0 : index
    %c7 = arith.constant 7 : index
    %77 = vector.load %arg5[%c0_21, %c7] : memref<16x9xf32, #tpu.memory_space<vmem>>, vector<16x1xf32>
    %78 = vector.broadcast %77 : vector<16x1xf32> to vector<16x256xf32>
    %79 = arith.mulf %76, %78 : vector<16x256xf32>
    %80 = arith.addf %72, %79 : vector<16x256xf32>
    %c239_i32 = arith.constant 239 : i32
    %81 = tpu.dynamic_rotate %17 by %c239_i32 dim 1 : vector<16x256xf32>, i32 -> vector<16x256xf32>
    %82 = vector.extract_strided_slice %18 {offsets = [7, 0], sizes = [1, 256], strides = [1, 1]} : vector<8x256xf32> to vector<1x256xf32>
    %83 = vector.broadcast %82 : vector<1x256xf32> to vector<16x256xf32>
    %84 = arith.mulf %81, %83 : vector<16x256xf32>
    %c0_22 = arith.constant 0 : index
    %c8 = arith.constant 8 : index
    %85 = vector.load %arg5[%c0_22, %c8] : memref<16x9xf32, #tpu.memory_space<vmem>>, vector<16x1xf32>
    %86 = vector.broadcast %85 : vector<16x1xf32> to vector<16x256xf32>
    %87 = arith.mulf %84, %86 : vector<16x256xf32>
    %88 = arith.addf %80, %87 : vector<16x256xf32>
    %cst_23 = arith.constant 2.000000e+01 : f32
    %89 = vector.broadcast %cst_23 : f32 to vector<16x256xf32>
    %90 = arith.minimumf %88, %89 : vector<16x256xf32>
    %91 = math.exp %90 : vector<16x256xf32>
    %cst_24 = arith.constant 2.000000e+00 : f32
    %92 = vector.broadcast %cst_24 : f32 to vector<16x256xf32>
    %93 = arith.addf %91, %92 : vector<16x256xf32>
    %94 = arith.mulf %91, %93 : vector<16x256xf32>
    %95 = arith.mulf %88, %94 : vector<16x256xf32>
    %cst_25 = arith.constant 2.000000e+00 : f32
    %96 = vector.broadcast %cst_25 : f32 to vector<16x256xf32>
    %97 = arith.addf %94, %96 : vector<16x256xf32>
    %98 = tpu.reciprocal %97 {approx = true} : vector<16x256xf32> -> vector<16x256xf32>
    %99 = arith.mulf %95, %98 : vector<16x256xf32>
    %cst_26 = arith.constant dense<0.000000e+00> : vector<16xf32>
    %100 = vector.multi_reduction <add>, %99, %cst_26 [1] : vector<16x256xf32> to vector<16xf32>
    %101 = vector.shape_cast %100 : vector<16xf32> to vector<16x1xf32>
    %cst_27 = arith.constant 2.560000e+02 : f32
    %102 = vector.broadcast %cst_27 : f32 to vector<16x1xf32>
    %103 = arith.divf %101, %102 : vector<16x1xf32>
    %104 = tpu.iota {dimensions = array<i32: 0>} : vector<16x1xi32>
    %cst_28 = arith.constant 0.000000e+00 : f32
    %105 = vector.broadcast %cst_28 : f32 to vector<16x1xf32>
    %c1_i32_29 = arith.constant 1 : i32
    %106 = tpu.dynamic_rotate %103 by %c1_i32_29 dim 0 : vector<16x1xf32>, i32 -> vector<16x1xf32>
    %c-1_i32 = arith.constant -1 : i32
    %107 = vector.broadcast %c-1_i32 : i32 to vector<16x1xi32>
    %108 = arith.addi %104, %107 : vector<16x1xi32>
    %c0_i32 = arith.constant 0 : i32
    %109 = vector.broadcast %c0_i32 : i32 to vector<16x1xi32>
    %110 = arith.cmpi sge, %108, %109 : vector<16x1xi32>
    %c-1_i32_30 = arith.constant -1 : i32
    %111 = vector.broadcast %c-1_i32_30 : i32 to vector<16x1xi32>
    %112 = arith.addi %104, %111 : vector<16x1xi32>
    %c16_i32_31 = arith.constant 16 : i32
    %113 = vector.broadcast %c16_i32_31 : i32 to vector<16x1xi32>
    %114 = arith.cmpi slt, %112, %113 : vector<16x1xi32>
    %115 = arith.andi %110, %114 : vector<16x1xi1>
    %cst_32 = arith.constant 0.000000e+00 : f32
    %116 = vector.broadcast %cst_32 : f32 to vector<16x1xf32>
    %117 = arith.select %115, %106, %116 : vector<16x1xi1>, vector<16x1xf32>
    %c0_33 = arith.constant 0 : index
    %118 = memref.load %arg1[%c0_33] : memref<3xf32, #tpu.memory_space<smem>>
    %119 = vector.broadcast %118 : f32 to vector<16x1xf32>
    %120 = arith.mulf %117, %119 : vector<16x1xf32>
    %121 = arith.addf %105, %120 : vector<16x1xf32>
    %c1_34 = arith.constant 1 : index
    %122 = memref.load %arg1[%c1_34] : memref<3xf32, #tpu.memory_space<smem>>
    %123 = vector.broadcast %122 : f32 to vector<16x1xf32>
    %124 = arith.mulf %103, %123 : vector<16x1xf32>
    %125 = arith.addf %121, %124 : vector<16x1xf32>
    %c15_i32_35 = arith.constant 15 : i32
    %126 = tpu.dynamic_rotate %103 by %c15_i32_35 dim 0 : vector<16x1xf32>, i32 -> vector<16x1xf32>
    %c1_i32_36 = arith.constant 1 : i32
    %127 = vector.broadcast %c1_i32_36 : i32 to vector<16x1xi32>
    %128 = arith.addi %104, %127 : vector<16x1xi32>
    %c0_i32_37 = arith.constant 0 : i32
    %129 = vector.broadcast %c0_i32_37 : i32 to vector<16x1xi32>
    %130 = arith.cmpi sge, %128, %129 : vector<16x1xi32>
    %c1_i32_38 = arith.constant 1 : i32
    %131 = vector.broadcast %c1_i32_38 : i32 to vector<16x1xi32>
    %132 = arith.addi %104, %131 : vector<16x1xi32>
    %c16_i32_39 = arith.constant 16 : i32
    %133 = vector.broadcast %c16_i32_39 : i32 to vector<16x1xi32>
    %134 = arith.cmpi slt, %132, %133 : vector<16x1xi32>
    %135 = arith.andi %130, %134 : vector<16x1xi1>
    %cst_40 = arith.constant 0.000000e+00 : f32
    %136 = vector.broadcast %cst_40 : f32 to vector<16x1xf32>
    %137 = arith.select %135, %126, %136 : vector<16x1xi1>, vector<16x1xf32>
    %c2_41 = arith.constant 2 : index
    %138 = memref.load %arg1[%c2_41] : memref<3xf32, #tpu.memory_space<smem>>
    %139 = vector.broadcast %138 : f32 to vector<16x1xf32>
    %140 = arith.mulf %137, %139 : vector<16x1xf32>
    %141 = arith.addf %125, %140 : vector<16x1xf32>
    %142 = arith.negf %141 : vector<16x1xf32>
    %143 = math.exp %142 : vector<16x1xf32>
    %cst_42 = arith.constant 1.000000e+00 : f32
    %144 = vector.broadcast %cst_42 : f32 to vector<16x1xf32>
    %145 = arith.addf %144, %143 : vector<16x1xf32>
    %146 = arith.divf %144, %145 : vector<16x1xf32>
    %147 = vector.broadcast %146 : vector<16x1xf32> to vector<16x256xf32>
    %148 = arith.mulf %99, %147 : vector<16x256xf32>
    %149 = arith.truncf %148 : vector<16x256xf32> to vector<16x256xbf16>
    %c0_43 = arith.constant 0 : index
    %c0_44 = arith.constant 0 : index
    %150 = vector.load %arg7[%c0_43, %c0_44] : memref<4x16xbf16, #tpu.memory_space<vmem>>, vector<4x16xbf16>
    %cst_45 = arith.constant dense<0.000000e+00> : vector<4x256xf32>
    %151 = tpu.matmul %150, %149, %cst_45 {dimension_numbers = #tpu.dot_dimension_numbers<[1], [0], [0], [1], [0, 0, 1, 1], [], []>} : vector<4x16xbf16>, vector<16x256xbf16>, vector<4x256xf32> -> vector<4x256xf32>
    %c0_46 = arith.constant 0 : index
    %c0_47 = arith.constant 0 : index
    %152 = vector.load %arg8[%c0_46, %c0_47] : memref<4x1xf32, #tpu.memory_space<vmem>>, vector<4x1xf32>
    %153 = vector.broadcast %152 : vector<4x1xf32> to vector<4x256xf32>
    %154 = arith.addf %151, %153 : vector<4x256xf32>
    %155 = arith.extf %1 : vector<4x256xbf16> to vector<4x256xf32>
    %156 = arith.addf %154, %155 : vector<4x256xf32>
    %c0_48 = arith.constant 0 : index
    %c0_49 = arith.constant 0 : index
    %c0_50 = arith.constant 0 : index
    %157 = vector.load %arg10[%c0_48, %c0_49, %c0_50] : memref<1x4x256xf32, #tpu.memory_space<vmem>>, vector<1x4x256xf32>
    %158 = vector.shape_cast %157 : vector<1x4x256xf32> to vector<4x256xf32>
    %159 = vector.shape_cast %156 : vector<4x256xf32> to vector<1x4x256xf32>
    tpu.vector_store %arg10[%c0_48, %c0_49, %c0_50], %159 {strides = array<i32>} : memref<1x4x256xf32, #tpu.memory_space<vmem>>, vector<1x4x256xf32>,
    return
  }
  func.func @transform_0(%arg0: i32) -> i32 {
    %c0_i32 = arith.constant 0 : i32
    %c0_i32_0 = arith.constant 0 : i32
    return %c0_i32 : i32
  }
  func.func @transform_1(%arg0: i32) -> (i32, i32, i32) {
    %c0_i32 = arith.constant 0 : i32
    %c0_i32_0 = arith.constant 0 : i32
    %c0_i32_1 = arith.constant 0 : i32
    return %arg0, %c0_i32, %c0_i32_0 : i32, i32, i32
  }
  func.func @transform_2(%arg0: i32) -> (i32, i32) {
    %c0_i32 = arith.constant 0 : i32
    %c0_i32_0 = arith.constant 0 : i32
    %c0_i32_1 = arith.constant 0 : i32
    return %c0_i32, %c0_i32_0 : i32, i32
  }
  func.func @transform_3(%arg0: i32) -> (i32, i32) {
    %c0_i32 = arith.constant 0 : i32
    %c0_i32_0 = arith.constant 0 : i32
    %c0_i32_1 = arith.constant 0 : i32
    return %c0_i32, %c0_i32_0 : i32, i32
  }
  func.func @transform_4(%arg0: i32) -> (i32, i32) {
    %c0_i32 = arith.constant 0 : i32
    %c0_i32_0 = arith.constant 0 : i32
    %c0_i32_1 = arith.constant 0 : i32
    return %c0_i32, %c0_i32_0 : i32, i32
  }
  func.func @transform_5(%arg0: i32) -> (i32, i32) {
    %c0_i32 = arith.constant 0 : i32
    %c0_i32_0 = arith.constant 0 : i32
    %c0_i32_1 = arith.constant 0 : i32
    return %c0_i32, %c0_i32_0 : i32, i32
  }
  func.func @transform_6(%arg0: i32) -> (i32, i32) {
    %c0_i32 = arith.constant 0 : i32
    %c0_i32_0 = arith.constant 0 : i32
    %c0_i32_1 = arith.constant 0 : i32
    return %c0_i32, %c0_i32_0 : i32, i32
  }
  func.func @transform_7(%arg0: i32) -> (i32, i32) {
    %c0_i32 = arith.constant 0 : i32
    %c0_i32_0 = arith.constant 0 : i32
    %c0_i32_1 = arith.constant 0 : i32
    return %c0_i32, %c0_i32_0 : i32, i32
  }
  func.func @transform_8(%arg0: i32) -> (i32, i32) {
    %c0_i32 = arith.constant 0 : i32
    %c0_i32_0 = arith.constant 0 : i32
    %c0_i32_1 = arith.constant 0 : i32
    return %c0_i32, %c0_i32_0 : i32, i32
  }
  func.func @transform_9(%arg0: i32) -> (i32, i32, i32) {
    %c0_i32 = arith.constant 0 : i32
    %c0_i32_0 = arith.constant 0 : i32
    %c0_i32_1 = arith.constant 0 : i32
    return %arg0, %c0_i32, %c0_i32_0 : i32, i32, i32
  }
}

</mosaic_0001>

<bundles_post_ra>
// kernel: tpu_custom_call.1
= control target key start
LH: loop header
LB: loop body
LE: loop exit
PB: predicated region body
PF: predicated region fallthrough
CT: control target
= control target key end

     0   :  { %14 = vsyncpa [#allocation4], 0  ;;  %s1787_s0 = inlined_call_operand.vmem [shape: f32[3], index: 0, kind: input, shape index: {}]   ;;  %s1788_s1 = inlined_call_operand.vmem [shape: bf16[2,4,256], index: 1, kind: input, shape index: {}]   ;;  %s1789_s2 = inlined_call_operand.vmem [shape: bf16[16,4], index: 2, kind: input, shape index: {}]   ;;  %s1790_s3 = inlined_call_operand.vmem [shape: f32[16,1], index: 3, kind: input, shape index: {}]   ;;  %s1791_s4 = inlined_call_operand.vmem [shape: f32[16,9], index: 4, kind: input, shape index: {}]   ;;  %s1792_s5 = inlined_call_operand.vmem [shape: f32[16,1], index: 5, kind: input, shape index: {}]   ;;  %s1793_s6 = inlined_call_operand.vmem [shape: bf16[4,16], index: 6, kind: input, shape index: {}]   ;;  %s1794_s7 = inlined_call_operand.vmem [shape: f32[4,1], index: 7, kind: input, shape index: {}]   ;;  %s1795_s8 = inlined_call_operand.vmem [shape: f32[8,256], index: 8, kind: input, shape index: {}]   ;;  %s1796_s9 = inlined_call_operand.hbm [shape: f32[2,4,256], index: 9, kind: output, shape index: {}]  }
   0x1   :  { %15 = vsyncpa [#allocation3], 0 }
   0x2   :  { %17 = vsyncpa [#allocation3 + $0x1], 0  ;;  %s1367_s30 = smov 0   ;;  %s1369_s10 = smov 0  }
   0x3   :  { %s1371_s11 = smov 0   ;;  %s1373_s12 = smov 0  }
   0x4 LB: > { %s1388_s13 = sadd.s32 4294967295, %s1296_s12   ;;  %s1056_s14 = sadd.s32 4294967294, %s1296_s12   ;;  %s1296_s12 = sphi %s1373_s12, %s1802_s12   ;;  %s1292_s11 = sphi %s1371_s11, %s1801_s11   ;;  %s1288_s10 = sphi %s1369_s10, %s1800_s10   ;;  %s1284_s30 = sphi %s1367_s30, %s1799_s30  }
   0x5   : > { %s1392_s15 = sadd.s32 1, %s1296_s12   ;;  %s224_s16 = sadd.s32 1, %s1292_s11 }
   0x6   : > { %s221_s17 = ssub.s32 %s1296_s12, %s1392_s15  ;;  %p234_p0 = scmp.ne.s32.totalorder %s1292_s11, %s1288_s10 }
   0x7   : > { %p222_p1 = scmp.eq.s32.totalorder %s221_s17, 0  ;;  %p235_p2 = scmp.eq.s32.totalorder %s1388_s13, 1 }
   0x8   : > { %p240_p3 = scmp.ne.s32.totalorder %s1288_s10, %s1284_s30  ;;  %p241_p4 = scmp.eq.s32.totalorder %s1056_s14, 1 }
   0x9   : > { %s1403_s18 = scalar_select %p222_p1, %s1292_s11, %s224_s16  }
   0xa   : > { %p1405_p5 = por %p235_p2, %p234_p0  ;;  %p1409_p6 = por %p241_p4, %p240_p3 }
   0xb   : > { %p1057_p7 = scmp.ge.s32.totalorder %s1296_s12, 1  ;;  %p248_p8 = scmp.lt.s32.totalorder %s1296_s12, 3 }
   0xc   : > { %p1099_p9 = scmp.eq.s32.totalorder %s1388_s13, 0  ;;  %s260_s23 = sshll.u32 %s1787_s0, 4  ;;  %s261_s23 = int_to_ptr.vmem [resolvable:$true] %s260_s23 }
   0xd   : > { %p249_p10 = pnand %p1057_p7, %p248_p8  ;;  %s1298_s24 = smov [#allocation2]  }
   0xf   : > { %p1091_p11 = pneg %p249_p10  ;;  %302 = sbr.rel (%p249_p10) target bundleno = 868 (0x364), region = 56 }
  0x11   : > { %p1092_p12 = pnand %p1099_p9, %p1091_p11 }
  0x13   : > { %1094 = dma.vmem_to_smem (!%p1092_p12), %s261_s23, 16, %s1298_s24, [#allocation4]  }
  0x14   : > { %1275 = dma.done.wait (%p1099_p9), [#allocation4], 16  }
  0x15   : > { %1277 = vsyncadd (%p1099_p9), [#allocation4], 4294967280 }
  0x16   : > { %309 = sfence }
  0x17   : > { %v1422_v0 = vld [vmem:[%s1791_s4] sm:$0xff]  ;;  %p340_p13 = scmp.lt.s32.totalorder %s1388_s13, 1  ;;  %v1299_v1 = vmov 4   ;;  %v1428_v2 = vld [vmem:[%s1791_s4 + $0x8] sm:$0xff]  ;;  %v1300_v4 = vmov 0   ;;  %vm374_vm0 = vcmask 1041408  }
  0x18   : > { %1153 = vset.pattern.permute.xlu0 %v1299_v1  ;;  %1155 = vset.pattern.permute.xlu1 %v1299_v1  ;;  %v462_v3 = vld [vmem:[%s1792_s5 + $0x8] sm:$0xff]  ;;  %v349_v6 = vld [vmem:[%s1790_s3] sm:$0xff]  ;;  %vm370_vm1 = vcmask 31744   ;;  %v1301_v15 = vmov 1   ;;  %v1302_v16 = vmov 2   ;;  %v1303_v17 = vmov 3  }
  0x19   : > { %449 = vperm.xlu0 %1153, %v1422_v0   ;;  %s341_s29 = scalar_select %p340_p13, %s1388_s13, 1  ;;  %454 = vperm.xlu1 %1155, %v1428_v2   ;;  %v461_v7 = vld [vmem:[%s1792_s5] sm:$0xff]  ;;  %v350_v14 = vld [vmem:[%s1790_s3 + $0x8] sm:$0xff]  ;;  %v1304_v18 = vmov 5   ;;  %v1305_v20 = vmov 6   ;;  %v1306_v35 = vmov 7  }
  0x1a   : > { %1157 = vset.pattern.permute.xlu2 %v1300_v4  ;;  %v1083_v13 = vld [vmem:[%s1789_s2] sm:$0xff]  ;;  %s1308_s21 = smov 17   ;;  %s1309_s22 = smov 127  }
  0x1b   : > { %s1082_s17 = sshll.u32 %s341_s29, 2  ;;  %470 = vperm.xlu2 %1157, %v462_v3   ;;  %s1311_s24 = smov 113  }
  0x1c   : > { %s344_s23 = scalar_lea.vmem %s1788_s1, %s1082_s17  ;;  %s1307_s17 = smov 1  }
  0x1d   : > { %v346_v5 = vld [vmem:[%s344_s23] sm:$0xf]  ;;  %s1310_s23 = smov 16   ;;  %s1312_s25 = smov 112  }
  0x1e   : > { %367 = vst [vmem:[#allocation1] ss:$4 sm:$0xff] %v346_v5  ;;  %v952_v8 = vunpack.c.l.bf16 %v346_v5  ;;  %s1313_s26 = smov 15   ;;  %s1314_s27 = smov 111  }
  0x1f   : > { %s1084_s29 = sshll.u32 %s1388_s13, 3 }
  0x21   : > { %1154 = vset.pattern.permute.xlu0 %v1300_v4  ;;  %1156 = vset.pattern.permute.xlu1 %v1300_v4 }
  0x22   : > { %353 = vperm.xlu0 %1154, %v349_v6   ;;  %465 = vperm.xlu1 %1156, %v461_v7  }
  0x23   : > { %1159 = vset.pattern.permute.xlu2 %v1301_v15 }
  0x24   : > { %538 = vperm.xlu2 %1159, %v1428_v2  }
  0x25   : > { %v368_v9 = vld.sshfl [vmem:[#allocation1] sm:$0xff pattern:$0x73625140]  ;;  %v369_v10 = vld.sshfl [vmem:[#allocation1 + $0x8] sm:$0xff pattern:$0x73625140] }
  0x26   : > { %v375_v11 = vsel %vm374_vm0, %v368_v9, 0  ;;  %v377_v12 = vsel %vm374_vm0, %v369_v10, 0  ;;  %954 = vst [vmem:[#allocation1] ss:$2 sm:$0xff] %v952_v8 }
  0x27   : > { %386 = vmatpush.bf16.msra.mxu0 %v375_v11  ;;  %400 = vmatpush.bf16.msra.mxu1 %v377_v12 }
  0x2a   : > { %1069 = vmatmul.msk.bf16.vlgmr.msra.gmra.mxu0 %vm370_vm1, %v1083_v13  ;;  %1070 = vmatmul.msk.bf16.vlgmr.msra.gmra.mxu1 %vm370_vm1, %v1083_v13 }
  0x2b   : > { %358 = vperm.xlu0 %1154, %v350_v14   ;;  %503 = vperm.xlu1 %1156, %v1428_v2  }
  0x2c   : > { %1161 = vset.pattern.permute.xlu2 %v1302_v16 }
  0x2d   : > { %573 = vperm.xlu2 %1161, %v1428_v2  }
  0x33   : > { %499 = vperm.xlu0 %1154, %v1422_v0   ;;  %1158 = vset.pattern.permute.xlu1 %v1301_v15 }
  0x34   : > { %534 = vperm.xlu1 %1158, %v1422_v0  }
  0x35   : > { %1163 = vset.pattern.permute.xlu2 %v1303_v17 }
  0x36   : > { %608 = vperm.xlu2 %1163, %v1428_v2  }
  0x3c   : > { %1160 = vset.pattern.permute.xlu1 %v1302_v16 }
  0x3d   : > { %569 = vperm.xlu1 %1160, %v1422_v0  }
  0x3e   : > { %1165 = vset.pattern.permute.xlu2 %v1304_v18 }
  0x3f   : > { %643 = vperm.xlu2 %1165, %v1428_v2  }
  0x45   : > { %1162 = vset.pattern.permute.xlu1 %v1303_v17 }
  0x46   : > { %604 = vperm.xlu1 %1162, %v1422_v0  }
  0x47   : > { %1167 = vset.pattern.permute.xlu2 %v1305_v20 }
  0x48   : > { %678 = vperm.xlu2 %1167, %v1428_v2  }
  0x4e   : > { %1164 = vset.pattern.permute.xlu1 %v1304_v18 }
  0x4f   : > { %639 = vperm.xlu1 %1164, %v1422_v0  }
  0x50   : > { %1169 = vset.pattern.permute.xlu2 %v1306_v35 }
  0x57   : > { %1166 = vset.pattern.permute.xlu1 %v1305_v20 }
  0x58   : > { %674 = vperm.xlu1 %1166, %v1422_v0  }
  0x60   : > { %1168 = vset.pattern.permute.xlu1 %v1306_v35 }
  0x75   : > { %v471_v13 = vpop.permute.xlu2 %470 }
  0x7e   : > { %v1496_v18 = vpop.permute.xlu2 %538 }
  0x8b   : > { %v1464_v19 = vpop.permute.xlu0 %449  ;;  %v455_v47 = vpop.permute.xlu1 %454 }
  0x94   : > { %v354_v21 = vpop.permute.xlu0 %353  ;;  %v466_v63 = vpop.permute.xlu1 %465 }
  0x9d   : > { %v359_v30 = vpop.permute.xlu0 %358  ;;  %v1503_v20 = vpop.permute.xlu1 %503 }
  0xa7   : > { %v388_v22 = vpop.f32.mrf.mxu0  ;;  %v402_v23 = vpop.f32.mrf.mxu1 }
  0xa8   : > { %v389_v24 = vadd.f32 %v388_v22, %v354_v21  ;;  %v403_v25 = vadd.f32 %v402_v23, %v354_v21  ;;  %v1315_v21 = vmov 8   ;;  %v535_v23 = vpop.permute.xlu1 %534 }
  0xa9   : > { %1170 = vset.pattern.permute.xlu0 %v1315_v21 }
  0xaa   : > { %v407_v26 = vmin.f32 %v389_v24, 20.0  ;;  %v408_v27 = vmin.f32 %v403_v25, 20.0 }
  0xac   : > { %v411_v28 = vmul.f32 1.442695, %v407_v26  ;;  %v413_v29 = vmul.f32 1.442695, %v408_v27 }
  0xae   : > { %1173 = vpow2.f32 %v411_v28 }
  0xaf   : > { %1175 = vpow2.f32 %v413_v29  ;;  %v390_v31 = vpop.f32.mrf.mxu0  ;;  %v404_v32 = vpop.f32.mrf.mxu1 }
  0xb0   : > { %v391_v33 = vadd.f32 %v390_v31, %v359_v30  ;;  %v405_v34 = vadd.f32 %v404_v32, %v359_v30  ;;  %v485_v30 = vlaneseq }
  0xb2   : > { %v409_v36 = vmin.f32 %v391_v33, 20.0  ;;  %v410_v37 = vmin.f32 %v405_v34, 20.0  ;;  %v1534_v32 = vand.u32 127, %v485_v30 }
  0xb4   : > { %v1174_v38 = vpop.eup %1173  ;;  %v415_v39 = vmul.f32 1.442695, %v409_v36  ;;  %v417_v40 = vmul.f32 1.442695, %v410_v37  ;;  %vm522_vm2 = vcmp.lt.s32.totalorder %v1534_v32, 16  ;;  %v500_v36 = vpop.permute.xlu0 %499  ;;  %vm487_vm3 = vcmp.lt.s32.totalorder %v1534_v32, 17 }
  0xb5   : > { %v1176_v41 = vpop.eup %1175  ;;  %v419_v42 = vadd.f32 2.0, %v1174_v38  ;;  %vm557_vm4 = vcmp.lt.s32.totalorder %v1534_v32, 15  ;;  %vm592_vm5 = vcmp.lt.s32.totalorder %v1534_v32, 1  ;;  %vm627_vm6 = vcmp.lt.s32.totalorder %v1534_v32, 127 }
  0xb6   : > { %v420_v43 = vadd.f32 2.0, %v1176_v41  ;;  %1177 = vpow2.f32 %v415_v39  ;;  %vm662_vm7 = vcmp.lt.s32.totalorder %v1534_v32, 113  ;;  %vm697_vm8 = vcmp.lt.s32.totalorder %v1534_v32, 112 }
  0xb7   : > { %v423_v44 = vmul.f32 %v1174_v38, %v419_v42  ;;  %1179 = vpow2.f32 %v417_v40  ;;  %vm732_vm9 = vcmp.lt.s32.totalorder %v1534_v32, 111 }
  0xb8   : > { %v424_v45 = vmul.f32 %v1176_v41, %v420_v43 }
  0xb9   : > { %v431_v46 = vadd.f32 2.0, %v423_v44  ;;  %v427_v54 = vmul.f32 %v423_v44, %v389_v24 }
  0xba   : > { %v432_v48 = vadd.f32 2.0, %v424_v45  ;;  %v428_v57 = vmul.f32 %v424_v45, %v403_v25  ;;  %v570_v25 = vpop.permute.xlu1 %569 }
  0xbb   : > { %1181 = vrcp.f32 %v431_v46 }
  0xbc   : > { %v1178_v49 = vpop.eup %1177  ;;  %1183 = vrcp.f32 %v432_v48 }
  0xbd   : > { %v1180_v50 = vpop.eup %1179  ;;  %v421_v51 = vadd.f32 2.0, %v1178_v49 }
  0xbe   : > { %v422_v52 = vadd.f32 2.0, %v1180_v50 }
  0xbf   : > { %v425_v53 = vmul.f32 %v1178_v49, %v421_v51 }
  0xc0   : > { %v426_v55 = vmul.f32 %v1180_v50, %v422_v52 }
  0xc1   : > { %v1182_v56 = vpop.eup %1181  ;;  %v433_v58 = vadd.f32 2.0, %v425_v53  ;;  %v429_v7 = vmul.f32 %v425_v53, %v391_v33  ;;  %v1539_v33 = vld [vmem:[%s1795_s8] sm:$0xff] }
  0xc2   : > { %v1184_v59 = vpop.eup %1183  ;;  %v439_v60 = vmul.f32 %v1182_v56, %v427_v54  ;;  %v434_v61 = vadd.f32 2.0, %v426_v55  ;;  %v430_v9 = vmul.f32 %v426_v55, %v405_v34  ;;  %v1526_v27 = vpop.permute.xlu1 %604  ;;  %v1544_v34 = vld [vmem:[%s1795_s8 + $0x8] sm:$0xff]  ;;  %v492_v43 = vperm.slane %v1539_v33, 0 }
  0xc3   : > { %v1468_v62 = vmul.f32 %v1184_v59, %v428_v57  ;;  %1185 = vrcp.f32 %v433_v58  ;;  %v528_v35 = vperm.slane %v1544_v34, 1  ;;  %v493_v44 = vperm.slane %v1544_v34, 0 }
  0xc4   : > { %1187 = vrcp.f32 %v434_v61  ;;  %584 = vrot.lane.b32.xlu0 %v439_v60, %s1307_s17  ;;  %477 = vrot.lane.b32.xlu1 %v439_v60, %s1308_s21  ;;  %v457_v1 = vmul.f32 %v1464_v19, %v439_v60  ;;  %v563_v61 = vperm.slane %v1544_v34, 2 }
  0xc5   : > { %481 = vrot.lane.b32.xlu2 %v1468_v62, %s1308_s21  ;;  %v458_v3 = vmul.f32 %v1464_v19, %v1468_v62  ;;  %v1501_v19 = vpop.permute.xlu2 %573 }
  0xc6   : > { %v1477_v5 = vadd.f32 %v466_v63, %v457_v1 }
  0xc7   : > { %v1479_v6 = vadd.f32 %v466_v63, %v458_v3 }
  0xc9   : > { %v1186_v8 = vpop.eup %1185 }
  0xca   : > { %v1188_v10 = vpop.eup %1187  ;;  %v441_v11 = vmul.f32 %v1186_v8, %v429_v7  ;;  %v1530_v29 = vpop.permute.xlu1 %639  ;;  %v598_v7 = vperm.slane %v1544_v34, 3 }
  0xcb   : > { %v442_v12 = vmul.f32 %v1188_v10, %v430_v9 }
  0xcc   : > { %v459_v14 = vmul.f32 %v455_v47, %v441_v11  ;;  %619 = vrot.lane.b32.xlu0 %v439_v60, %s1309_s22  ;;  %479 = vrot.lane.b32.xlu1 %v441_v11, %s1308_s21 }
  0xcd   : > { %v460_v15 = vmul.f32 %v455_v47, %v442_v12  ;;  %514 = vrot.lane.b32.xlu2 %v439_v60, %s1310_s23  ;;  %v1509_v22 = vpop.permute.xlu2 %608 }
  0xce   : > { %v1483_v16 = vadd.f32 %v471_v13, %v459_v14 }
  0xcf   : > { %v1485_v17 = vadd.f32 %v471_v13, %v460_v15 }
  0xd4   : > { %654 = vrot.lane.b32.xlu0 %v439_v60, %s1311_s24  ;;  %709 = vperm.xlu1 %1168, %v1422_v0  }
  0xd5   : > { %518 = vrot.lane.b32.xlu2 %v1468_v62, %s1310_s23  ;;  %v1515_v24 = vpop.permute.xlu2 %643 }
  0xdc   : > { %689 = vrot.lane.b32.xlu0 %v439_v60, %s1312_s25  ;;  %516 = vrot.lane.b32.xlu1 %v441_v11, %s1310_s23 }
  0xdd   : > { %549 = vrot.lane.b32.xlu2 %v439_v60, %s1313_s26  ;;  %1171 = vset.pattern.permute.xlu1 %v1315_v21  ;;  %v1524_v26 = vpop.permute.xlu2 %678 }
  0xe4   : > { %724 = vrot.lane.b32.xlu0 %v439_v60, %s1314_s27  ;;  %551 = vrot.lane.b32.xlu1 %v441_v11, %s1313_s26  ;;  %v562_v60 = vperm.slane %v1539_v33, 2 }
  0xe5   : > { %553 = vrot.lane.b32.xlu2 %v1468_v62, %s1313_s26 }
  0xec   : > { %520 = vrot.lane.b32.xlu0 %v442_v12, %s1310_s23  ;;  %586 = vrot.lane.b32.xlu1 %v441_v11, %s1307_s17 }
  0xed   : > { %588 = vrot.lane.b32.xlu2 %v1468_v62, %s1307_s17 }
  0xf4   : > { %555 = vrot.lane.b32.xlu0 %v442_v12, %s1313_s26  ;;  %621 = vrot.lane.b32.xlu1 %v441_v11, %s1309_s22 }
  0xf5   : > { %623 = vrot.lane.b32.xlu2 %v1468_v62, %s1309_s22 }
  0xfc   : > { %590 = vrot.lane.b32.xlu0 %v442_v12, %s1307_s17  ;;  %656 = vrot.lane.b32.xlu1 %v441_v11, %s1311_s24  ;;  %s1742_s17 = sld [smem:[#allocation2 + $0x1]] }
  0xfd   : > { %658 = vrot.lane.b32.xlu2 %v1468_v62, %s1311_s24 }
 0x104   : > { %625 = vrot.lane.b32.xlu0 %v442_v12, %s1309_s22  ;;  %691 = vrot.lane.b32.xlu1 %v441_v11, %s1312_s25  ;;  %s1072_s22 = sld [smem:[#allocation2 + $0x2]] }
 0x105   : > { %693 = vrot.lane.b32.xlu2 %v1468_v62, %s1312_s25 }
 0x10c   : > { %660 = vrot.lane.b32.xlu0 %v442_v12, %s1311_s24  ;;  %726 = vrot.lane.b32.xlu1 %v441_v11, %s1314_s27 }
 0x10d   : > { %483 = vrot.lane.b32.xlu2 %v442_v12, %s1308_s21  ;;  %s828_s21 = sld [smem:[#allocation2]] }
 0x114   : > { %695 = vrot.lane.b32.xlu0 %v442_v12, %s1312_s25  ;;  %748 = vperm.xlu1 %1171, %v1428_v2  }
 0x115   : > { %728 = vrot.lane.b32.xlu2 %v1468_v62, %s1314_s27 }
 0x11c   : > { %730 = vrot.lane.b32.xlu0 %v442_v12, %s1314_s27  ;;  %s337_s27 = sand.u32 1, %s1288_s10  }
 0x11d   : > { %713 = vperm.xlu2 %1169, %v1428_v2   ;;  %v1546_v2 = vpop.permute.xlu1 %674  ;;  %s1062_s28 = sshll.u32 %s337_s27, 3  ;;  %s969_s13 = scalar_lea.sflag [#allocation3], %s337_s27 }
 0x11f   : > { %v482_v28 = vpop.permute.xlu2 %481 }
 0x124   : > { %744 = vperm.xlu0 %1170, %v1422_v0   ;;  %v527_v0 = vperm.slane %v1539_v33, 1 }
 0x127   : > { %v515_v31 = vpop.permute.xlu2 %514 }
 0x12c   : > { %1172 = vset.pattern.permute.xlu0 %v1300_v4 }
 0x12f   : > { %v519_v37 = vpop.permute.xlu2 %518 }
 0x130   : > { %v523_v38 = vsel %vm522_vm2, %v515_v31, %v519_v37  ;;  %v525_v39 = vsel %vm522_vm2, %v519_v37, %v515_v31 }
 0x131   : > { %v529_v40 = vmul.f32 %v527_v0, %v525_v39  ;;  %v530_v4 = vmul.f32 %v528_v35, %v523_v38  ;;  %v632_v38 = vperm.slane %v1539_v33, 4  ;;  %v633_v39 = vperm.slane %v1544_v34, 4 }
 0x133   : > { %v541_v41 = vmul.f32 %v535_v23, %v529_v40  ;;  %v542_v42 = vmul.f32 %v535_v23, %v530_v4 }
 0x136   : > { %v585_v45 = vpop.permute.xlu0 %584  ;;  %v478_v46 = vpop.permute.xlu1 %477 }
 0x137   : > { %v550_v47 = vpop.permute.xlu2 %549  ;;  %v488_v48 = vsel %vm487_vm3, %v478_v46, %v482_v28  ;;  %v490_v49 = vsel %vm487_vm3, %v482_v28, %v478_v46 }
 0x138   : > { %v494_v50 = vmul.f32 %v492_v43, %v490_v49  ;;  %v495_v51 = vmul.f32 %v493_v44, %v488_v48 }
 0x13a   : > { %v506_v52 = vmul.f32 %v500_v36, %v494_v50  ;;  %v507_v53 = vmul.f32 %v500_v36, %v495_v51  ;;  %v667_v51 = vperm.slane %v1539_v33, 5 }
 0x13c   : > { %v510_v54 = vadd.f32 %v506_v52, %v1477_v5  ;;  %v511_v55 = vadd.f32 %v507_v53, %v1479_v6  ;;  %v597_v6 = vperm.slane %v1539_v33, 3  ;;  %v668_v52 = vperm.slane %v1544_v34, 5 }
 0x13e   : > { %v620_v56 = vpop.permute.xlu0 %619  ;;  %v545_v57 = vadd.f32 %v541_v41, %v510_v54  ;;  %v546_v58 = vadd.f32 %v542_v42, %v511_v55  ;;  %v1574_v59 = vpop.permute.xlu1 %479 }
 0x13f   : > { %v554_v62 = vpop.permute.xlu2 %553 }
 0x140   : > { %v558_v63 = vsel %vm557_vm4, %v550_v47, %v554_v62  ;;  %v560_v1 = vsel %vm557_vm4, %v554_v62, %v550_v47 }
 0x141   : > { %v564_v3 = vmul.f32 %v562_v60, %v560_v1  ;;  %v565_v5 = vmul.f32 %v563_v61, %v558_v63 }
 0x143   : > { %v576_v10 = vmul.f32 %v570_v25, %v564_v3  ;;  %v577_v11 = vmul.f32 %v570_v25, %v565_v5  ;;  %v702_v5 = vperm.slane %v1539_v33, 6 }
 0x145   : > { %v580_v23 = vadd.f32 %v576_v10, %v545_v57  ;;  %v581_v28 = vadd.f32 %v577_v11, %v546_v58  ;;  %v703_v10 = vperm.slane %v1544_v34, 6 }
 0x146   : > { %v655_v8 = vpop.permute.xlu0 %654  ;;  %v710_v9 = vpop.permute.xlu1 %709 }
 0x147   : > { %v589_v12 = vpop.permute.xlu2 %588 }
 0x148   : > { %v593_v13 = vsel %vm592_vm5, %v585_v45, %v589_v12  ;;  %v595_v14 = vsel %vm592_vm5, %v589_v12, %v585_v45 }
 0x149   : > { %v599_v15 = vmul.f32 %v597_v6, %v595_v14  ;;  %v600_v21 = vmul.f32 %v598_v7, %v593_v13 }
 0x14b   : > { %v611_v31 = vmul.f32 %v1526_v27, %v599_v15  ;;  %v612_v36 = vmul.f32 %v1526_v27, %v600_v21 }
 0x14d   : > { %v615_v25 = vadd.f32 %v611_v31, %v580_v23  ;;  %v616_v37 = vadd.f32 %v612_v36, %v581_v28 }
 0x14e   : > { %v690_v40 = vpop.permute.xlu0 %689  ;;  %v517_v4 = vpop.permute.xlu1 %516 }
 0x14f   : > { %v624_v41 = vpop.permute.xlu2 %623 }
 0x150   : > { %v628_v42 = vsel %vm627_vm6, %v620_v56, %v624_v41  ;;  %v630_v45 = vsel %vm627_vm6, %v624_v41, %v620_v56 }
 0x151   : > { %v634_v27 = vmul.f32 %v632_v38, %v628_v42  ;;  %v635_v46 = vmul.f32 %v633_v39, %v630_v45 }
 0x153   : > { %v646_v47 = vmul.f32 %v1530_v29, %v634_v27  ;;  %v647_v48 = vmul.f32 %v1530_v29, %v635_v46 }
 0x155   : > { %v650_v49 = vadd.f32 %v646_v47, %v615_v25  ;;  %v651_v50 = vadd.f32 %v647_v48, %v616_v37 }
 0x156   : > { %v1615_v53 = vpop.permute.xlu0 %724  ;;  %v552_v54 = vpop.permute.xlu1 %551 }
 0x157   : > { %v659_v55 = vpop.permute.xlu2 %658 }
 0x158   : > { %v663_v56 = vsel %vm662_vm7, %v655_v8, %v659_v55  ;;  %v665_v57 = vsel %vm662_vm7, %v659_v55, %v655_v8 }
 0x159   : > { %v669_v29 = vmul.f32 %v667_v51, %v663_v56  ;;  %v670_v58 = vmul.f32 %v668_v52, %v665_v57 }
 0x15b   : > { %v681_v62 = vmul.f32 %v1546_v2, %v669_v29  ;;  %v682_v63 = vmul.f32 %v1546_v2, %v670_v58 }
 0x15d   : > { %v685_v1 = vadd.f32 %v681_v62, %v650_v49  ;;  %v686_v3 = vadd.f32 %v682_v63, %v651_v50 }
 0x15e   : > { %v521_v11 = vpop.permute.xlu0 %520  ;;  %v587_v12 = vpop.permute.xlu1 %586 }
 0x15f   : > { %v694_v8 = vpop.permute.xlu2 %693  ;;  %v524_v47 = vsel %vm522_vm2, %v517_v4, %v521_v11  ;;  %v526_v48 = vsel %vm522_vm2, %v521_v11, %v517_v4 }
 0x160   : > { %v698_v13 = vsel %vm697_vm8, %v690_v40, %v694_v8  ;;  %v700_v14 = vsel %vm697_vm8, %v694_v8, %v690_v40 }
 0x161   : > { %v704_v2 = vmul.f32 %v702_v5, %v698_v13  ;;  %v705_v15 = vmul.f32 %v703_v10, %v700_v14 }
 0x163   : > { %v716_v21 = vmul.f32 %v710_v9, %v704_v2  ;;  %v717_v23 = vmul.f32 %v710_v9, %v705_v15 }
 0x165   : > { %v1638_v28 = vadd.f32 %v716_v21, %v685_v1  ;;  %v1640_v31 = vadd.f32 %v717_v23, %v686_v3 }
 0x166   : > { %v556_v36 = vpop.permute.xlu0 %555  ;;  %v622_v25 = vpop.permute.xlu1 %621 }
 0x167   : > { %v484_v41 = vpop.permute.xlu2 %483  ;;  %v561_v57 = vsel %vm557_vm4, %v556_v36, %v552_v54 }
 0x168   : > { %v489_v40 = vsel %vm487_vm3, %v1574_v59, %v484_v41  ;;  %v491_v45 = vsel %vm487_vm3, %v484_v41, %v1574_v59  ;;  %v531_v59 = vmul.f32 %v527_v0, %v526_v48  ;;  %v566_v62 = vmul.f32 %v562_v60, %v561_v57 }
 0x169   : > { %v496_v9 = vmul.f32 %v492_v43, %v491_v45  ;;  %v497_v46 = vmul.f32 %v493_v44, %v489_v40  ;;  %v532_v43 = vmul.f32 %v528_v35, %v524_v47  ;;  %v559_v44 = vsel %vm557_vm4, %v552_v54, %v556_v36 }
 0x16a   : > { %v543_v58 = vmul.f32 %v1496_v18, %v531_v59  ;;  %v567_v54 = vmul.f32 %v563_v61, %v559_v44 }
 0x16b   : > { %v508_v49 = vmul.f32 %v1503_v20, %v496_v9  ;;  %v509_v50 = vmul.f32 %v1503_v20, %v497_v46  ;;  %v544_v35 = vmul.f32 %v1496_v18, %v532_v43  ;;  %v738_v9 = vperm.slane %v1544_v34, 7 }
 0x16c   : > { %v579_v14 = vmul.f32 %v1501_v19, %v567_v54 }
 0x16d   : > { %v512_v4 = vadd.f32 %v508_v49, %v1483_v16  ;;  %v513_v29 = vadd.f32 %v509_v50, %v1485_v17 }
 0x16e   : > { %v591_v37 = vpop.permute.xlu0 %590  ;;  %v657_v42 = vpop.permute.xlu1 %656 }
 0x16f   : > { %v594_v20 = vsel %vm592_vm5, %v587_v12, %v591_v37  ;;  %v596_v0 = vsel %vm592_vm5, %v591_v37, %v587_v12  ;;  %v729_v63 = vpop.permute.xlu2 %728  ;;  %v547_v18 = vadd.f32 %v543_v58, %v512_v4  ;;  %v548_v11 = vadd.f32 %v544_v35, %v513_v29 }
 0x170   : > { %v601_v1 = vmul.f32 %v597_v6, %v596_v0  ;;  %v602_v3 = vmul.f32 %v598_v7, %v594_v20  ;;  %v578_v6 = vmul.f32 %v1501_v19, %v566_v62  ;;  %v735_v34 = vsel %vm732_vm9, %v729_v63, %v1615_v53 }
 0x171   : > { %v740_v58 = vmul.f32 %v738_v9, %v735_v34 }
 0x172   : > { %v613_v21 = vmul.f32 %v1509_v22, %v601_v1  ;;  %v614_v23 = vmul.f32 %v1509_v22, %v602_v3  ;;  %v582_v36 = vadd.f32 %v578_v6, %v547_v18 }
 0x174   : > { %v617_v22 = vadd.f32 %v613_v21, %v582_v36 }
 0x176   : > { %v626_v27 = vpop.permute.xlu0 %625  ;;  %v692_v55 = vpop.permute.xlu1 %691 }
 0x177   : > { %v629_v16 = vsel %vm627_vm6, %v622_v25, %v626_v27  ;;  %v631_v17 = vsel %vm627_vm6, %v626_v27, %v622_v25  ;;  %v583_v25 = vadd.f32 %v579_v14, %v548_v11  ;;  %v714_v40 = vpop.permute.xlu2 %713 }
 0x178   : > { %v636_v8 = vmul.f32 %v632_v38, %v629_v16  ;;  %v637_v12 = vmul.f32 %v633_v39, %v631_v17 }
 0x179   : > { %v618_v45 = vadd.f32 %v614_v23, %v583_v25 }
 0x17a   : > { %v648_v19 = vmul.f32 %v1515_v24, %v636_v8  ;;  %v649_v37 = vmul.f32 %v1515_v24, %v637_v12 }
 0x17c   : > { %v652_v24 = vadd.f32 %v648_v19, %v617_v22  ;;  %v653_v46 = vadd.f32 %v649_v37, %v618_v45 }
 0x17e   : > { %v661_v56 = vpop.permute.xlu0 %660  ;;  %v727_v7 = vpop.permute.xlu1 %726 }
 0x17f   : > { %v664_v60 = vsel %vm662_vm7, %v657_v42, %v661_v56  ;;  %v666_v61 = vsel %vm662_vm7, %v661_v56, %v657_v42  ;;  %vm922_vm7 = vcmask 130048  }
 0x180   : > { %v671_v38 = vmul.f32 %v667_v51, %v664_v60  ;;  %v672_v39 = vmul.f32 %v668_v52, %v666_v61  ;;  %v737_v52 = vperm.slane %v1539_v33, 7  ;;  %v733_v33 = vsel %vm732_vm9, %v1615_v53, %v729_v63 }
 0x182   : > { %v683_v51 = vmul.f32 %v1524_v26, %v671_v38  ;;  %v684_v27 = vmul.f32 %v1524_v26, %v672_v39  ;;  %v739_v0 = vmul.f32 %v737_v52, %v733_v33 }
 0x184   : > { %v688_v26 = vadd.f32 %v684_v27, %v653_v46 }
 0x186   : > { %v696_v13 = vpop.permute.xlu0 %695  ;;  %v749_v50 = vpop.permute.xlu1 %748 }
 0x187   : > { %v699_v2 = vsel %vm697_vm8, %v692_v55, %v696_v13  ;;  %v701_v15 = vsel %vm697_vm8, %v696_v13, %v692_v55  ;;  %v687_v55 = vadd.f32 %v683_v51, %v652_v24  ;;  %vm964_vm8 = vcmask 1043456  }
 0x188   : > { %v706_v41 = vmul.f32 %v702_v5, %v699_v2  ;;  %v707_v42 = vmul.f32 %v703_v10, %v701_v15 }
 0x18a   : > { %v718_v47 = vmul.f32 %v714_v40, %v706_v41  ;;  %v719_v5 = vmul.f32 %v714_v40, %v707_v42 }
 0x18c   : > { %v722_v56 = vadd.f32 %v718_v47, %v687_v55  ;;  %v723_v44 = vadd.f32 %v719_v5, %v688_v26  ;;  %v1316_v47 = vmov 256.0  }
 0x18e   : > { %v731_v48 = vpop.permute.xlu0 %730 }
 0x18f   : > { %v734_v10 = vsel %vm732_vm9, %v727_v7, %v731_v48  ;;  %v736_v49 = vsel %vm732_vm9, %v731_v48, %v727_v7 }
 0x190   : > { %v741_v59 = vmul.f32 %v737_v52, %v734_v10  ;;  %v742_v43 = vmul.f32 %v738_v9, %v736_v49 }
 0x192   : > { %v753_v57 = vmul.f32 %v749_v50, %v741_v59  ;;  %v754_v4 = vmul.f32 %v749_v50, %v742_v43  ;;  %v811_v50 = vshrl.u32 %v485_v30, 7 }
 0x194   : > { %v757_v29 = vadd.f32 %v753_v57, %v722_v56  ;;  %v758_v20 = vadd.f32 %v754_v4, %v723_v44  ;;  %v812_v26 = vadd.s32 8, %v811_v50  ;;  %v818_v33 = vadd.s32 4294967295, %v811_v50 }
 0x195   : > { %v835_v57 = vstv %s1742_s17  ;;  %v829_v4 = vstv %s828_s21  ;;  %vm815_vm11 = vcmp.lt.s32.totalorder %v811_v50, 1  ;;  %vm842_vm13 = vcmp.lt.s32.totalorder %v811_v50, 7  ;;  %s980_s17 = scalar_lea.hbm %s1796_s9, %s1084_s29  ;;  %s339_s21 = scalar_lea.vmem [#allocation5], %s1062_s28 }
 0x196   : > { %v761_v35 = vmin.f32 %v757_v29, 20.0  ;;  %v762_v62 = vmin.f32 %v758_v20, 20.0  ;;  %v745_v54 = vpop.permute.xlu0 %744  ;;  %v846_v34 = vadd.s32 1, %v812_v26  ;;  %vm820_vm12 = vcmp.ge.s32.totalorder %v818_v33, 0  ;;  %s984_s23 = sshll.u32 %s980_s17, 4  ;;  %s1250_s29 = scalar_lea.hbm %s1796_s9, 16  ;;  %s985_s23 = int_to_ptr.hbm [resolvable:$true] %s984_s23 }
 0x197   : > { %v751_v16 = vmul.f32 %v745_v54, %v739_v0  ;;  %v752_v17 = vmul.f32 %v745_v54, %v740_v58  ;;  %s1244_s24 = sshra.s32 %s985_s23, 4  ;;  %s1245_s24 = int_to_ptr.hbm [resolvable:$true] %s1244_s24 }
 0x198   : > { %v767_v1 = vmul.f32 1.442695, %v761_v35  ;;  %v769_v3 = vmul.f32 1.442695, %v762_v62  ;;  %vm850_vm14 = vcmp.lt.s32.totalorder %v846_v34, 16  ;;  %v856_v35 = vstv %s1072_s22  ;;  %s982_s22 = sshll.u32 %s339_s21, 4  ;;  %p1251_p3 = scmp.lt.s32.totalorder %s1245_s24, %s1796_s9  ;;  %s983_s22 = int_to_ptr.vmem [resolvable:$true] %s982_s22 }
 0x199   : > { %v755_v18 = vadd.f32 %v751_v16, %v1638_v28  ;;  %v756_v32 = vadd.f32 %v752_v17, %v1640_v31  ;;  %s1246_s25 = scalar_lea.hbm %s1245_s24, 8 }
 0x19a   : > { %1189 = vpow2.f32 %v767_v1  ;;  %p1247_p0 = scmp.ne.s32.totalorder %s1245_s24, %s1246_s25  ;;  %p1252_p4 = scmp.lt.s32.totalorder %s1250_s29, %s1246_s25 }
 0x19b   : > { %1191 = vpow2.f32 %v769_v3  ;;  %v759_v53 = vmin.f32 %v755_v18, 20.0  ;;  %v760_v63 = vmin.f32 %v756_v32, 20.0 }
 0x19c   : > { %p1248_p1 = pnand %p1247_p0, %p1405_p5  ;;  %p1253_p7 = por %p1252_p4, %p1251_p3 }
 0x19d   : > { %v763_v11 = vmul.f32 1.442695, %v759_v53  ;;  %v765_v60 = vmul.f32 1.442695, %v760_v63 }
 0x19e   : > { %p1249_p2 = pneg %p1248_p1 }
 0x19f   : > { %1193 = vpow2.f32 %v763_v11 }
 0x1a0   : > { %v1190_v61 = vpop.eup %1189  ;;  %1195 = vpow2.f32 %v765_v60  ;;  %p1254_p8 = pnand %p1253_p7, %p1249_p2 }
 0x1a1   : > { %v1192_v8 = vpop.eup %1191  ;;  %v773_v12 = vadd.f32 2.0, %v1190_v61 }
 0x1a2   : > { %v774_v13 = vadd.f32 2.0, %v1192_v8 }
 0x1a3   : > { %v777_v6 = vmul.f32 %v1190_v61, %v773_v12 }
 0x1a4   : > { %v778_v14 = vmul.f32 %v1192_v8, %v774_v13 }
 0x1a5   : > { %v1194_v7 = vpop.eup %1193  ;;  %v785_v2 = vadd.f32 2.0, %v777_v6  ;;  %v781_v25 = vmul.f32 %v777_v6, %v757_v29 }
 0x1a6   : > { %v1196_v15 = vpop.eup %1195  ;;  %v786_v28 = vadd.f32 2.0, %v778_v14  ;;  %v771_v21 = vadd.f32 2.0, %v1194_v7  ;;  %v782_v37 = vmul.f32 %v778_v14, %v758_v20 }
 0x1a7   : > { %1197 = vrcp.f32 %v785_v2  ;;  %v772_v31 = vadd.f32 2.0, %v1196_v15 }
 0x1a8   : > { %1199 = vrcp.f32 %v786_v28  ;;  %v775_v23 = vmul.f32 %v1194_v7, %v771_v21 }
 0x1a9   : > { %v776_v38 = vmul.f32 %v1196_v15, %v772_v31 }
 0x1aa   : > { %v783_v39 = vadd.f32 2.0, %v775_v23  ;;  %v779_v45 = vmul.f32 %v775_v23, %v755_v18 }
 0x1ab   : > { %v784_v36 = vadd.f32 2.0, %v776_v38  ;;  %v780_v27 = vmul.f32 %v776_v38, %v756_v32 }
 0x1ac   : > { %1201 = vrcp.f32 %v783_v39 }
 0x1ad   : > { %v1198_v19 = vpop.eup %1197  ;;  %1203 = vrcp.f32 %v784_v36 }
 0x1ae   : > { %v1200_v41 = vpop.eup %1199  ;;  %v1729_v42 = vmul.f32 %v1198_v19, %v781_v25  ;;  %1205 = vrcp.f32 %v1316_v47 }
 0x1af   : > { %v1731_v40 = vmul.f32 %v1200_v41, %v782_v37 }
 0x1b1   : > { %v798_v22 = vadd.f32 %v1731_v40, %v1729_v42 }
 0x1b2   : > { %v1202_v51 = vpop.eup %1201 }
 0x1b3   : > { %v1204_v52 = vpop.eup %1203  ;;  %799 = vadd.xlane.f32.xlu1 %v798_v22  ;;  %v1735_v9 = vmul.f32 %v1202_v51, %v779_v45 }
 0x1b4   : > { %v1737_v24 = vmul.f32 %v1204_v52, %v780_v27  ;;  %v1206_v5 = vpop.eup %1205 }
 0x1b5   : > { %v802_v48 = vmul.f32 256.0, %v1206_v5  ;;  %vm806_vm10 = vweird.f32 %v1206_v5 }
 0x1b6   : > { %v795_v46 = vadd.f32 %v1737_v24, %v1735_v9 }
 0x1b7   : > { %v803_v10 = vsub.f32 1.0, %v802_v48 }
 0x1b8   : > { %796 = vadd.xlane.f32.xlu2 %v795_v46 }
 0x1b9   : > { %v804_v49 = vmul.f32 %v1206_v5, %v803_v10 }
 0x1bb   : > { %v805_v55 = vadd.f32 %v1206_v5, %v804_v49  ;;  %v916_v49 = vld [vmem:[%s1794_s7] sm:$0xf] }
 0x1bd   : > { %v807_v59 = vsel %vm806_vm10, %v1206_v5, %v805_v55 }
 0x226   : > { %v800_v43 = vpop.xlane.xlu1 %799 }
 0x227   : > { %v809_v56 = vmul.f32 %v807_v59, %v800_v43 }
 0x229   : > { %v814_v30 = vrot.slane %v809_v56, 7  ;;  %v841_v20 = vrot.slane %v809_v56, 1  ;;  %v837_v62 = vmul.f32 %v835_v57, %v809_v56 }
 0x22b   : > { %v797_v44 = vpop.xlane.xlu2 %796 }
 0x22c   : > { %v808_v29 = vmul.f32 %v807_v59, %v797_v44  ;;  %v915_v44 = vld [vmem:[%s1793_s6] sm:$0x3] }
 0x22e   : > { %v813_v0 = vrot.slane %v808_v29, 7  ;;  %v840_v58 = vrot.slane %v808_v29, 1  ;;  %v836_v63 = vmul.f32 %v835_v57, %v808_v29  ;;  %v955_v29 = vld.sshfl [vmem:[#allocation1] sm:$0xff pattern:$0x75316420] }
 0x230   : > { %v816_v54 = vsel %vm815_vm11, %v813_v0, %v814_v30  ;;  %v817_v16 = vsel %vm815_vm11, %v814_v30, %v813_v0  ;;  %v844_v17 = vsel %vm842_vm13, %v841_v20, %v840_v58  ;;  %v843_v18 = vsel %vm842_vm13, %v840_v58, %v841_v20 }
 0x231   : > { %v826_v1 = vsel %vm820_vm12, %v817_v16, 0.0  ;;  %v831_v3 = vmul.f32 %v829_v4, %v816_v54  ;;  %v854_v32 = vsel %vm850_vm14, %v844_v17, 0.0  ;;  %v857_v8 = vmul.f32 %v856_v35, %v843_v18 }
 0x232   : > { %v830_v53 = vmul.f32 %v829_v4, %v826_v1  ;;  %v858_v11 = vmul.f32 %v856_v35, %v854_v32 }
 0x233   : > { %v839_v60 = vadd.f32 %v837_v62, %v831_v3 }
 0x234   : > { %v838_v61 = vadd.f32 %v836_v63, %v830_v53 }
 0x235   : > { %v860_v12 = vadd.f32 %v858_v11, %v839_v60 }
 0x236   : > { %v859_v13 = vadd.f32 %v857_v8, %v838_v61 }
 0x237   : > { %v1074_v6 = vmul.f32 -1.442695, %v860_v12 }
 0x238   : > { %v1073_v14 = vmul.f32 -1.442695, %v859_v13 }
 0x239   : > { %1207 = vpow2.f32 %v1074_v6 }
 0x23a   : > { %1209 = vpow2.f32 %v1073_v14 }
 0x23f   : > { %v1208_v7 = vpop.eup %1207 }
 0x240   : > { %v1210_v2 = vpop.eup %1209  ;;  %v868_v15 = vadd.f32 1.0, %v1208_v7 }
 0x241   : > { %v867_v28 = vadd.f32 1.0, %v1210_v2 }
 0x242   : > { %1211 = vrcp.f32 %v868_v15  ;;  %v895_v46 = vand.u32 2147483648, %v868_v15  ;;  %vm889_vm4 = vweird.f32 %v868_v15  ;;  %v893_v47 = vand.u32 2147483647, %v868_v15 }
 0x243   : > { %1213 = vrcp.f32 %v867_v28  ;;  %v880_v25 = vand.u32 2147483648, %v867_v28  ;;  %v878_v37 = vand.u32 2147483647, %v867_v28  ;;  %vm874_vm0 = vweird.f32 %v867_v28 }
 0x244   : > { %v896_v48 = vor.u32 1.1754944e-38, %v895_v46  ;;  %vm894_vm6 = vcmp.eq.f32.partialorder %v893_v47, 8.507059e+37 }
 0x245   : > { %v881_v45 = vor.u32 1.1754944e-38, %v880_v25  ;;  %vm879_vm2 = vcmp.eq.f32.partialorder %v878_v37, 8.507059e+37 }
 0x248   : > { %v1212_v21 = vpop.eup %1211 }
 0x249   : > { %v1214_v31 = vpop.eup %1213  ;;  %v885_v23 = vmul.f32 %v1212_v21, %v868_v15  ;;  %vm890_vm3 = vweird.f32 %v1212_v21 }
 0x24a   : > { %v870_v38 = vmul.f32 %v1214_v31, %v867_v28  ;;  %vm875_vm15 = vweird.f32 %v1214_v31  ;;  %vm891_vm5 = vmor %vm889_vm4, %vm890_vm3 }
 0x24b   : > { %v886_v36 = vsub.f32 1.0, %v885_v23  ;;  %vm876_vm1 = vmor %vm874_vm0, %vm875_vm15 }
 0x24c   : > { %v871_v39 = vsub.f32 1.0, %v870_v38 }
 0x24d   : > { %v887_v22 = vmul.f32 %v1212_v21, %v886_v36 }
 0x24e   : > { %v872_v19 = vmul.f32 %v1214_v31, %v871_v39 }
 0x24f   : > { %v888_v52 = vadd.f32 %v1212_v21, %v887_v22 }
 0x250   : > { %v873_v41 = vadd.f32 %v1214_v31, %v872_v19 }
 0x251   : > { %v892_v5 = vsel %vm891_vm5, %v1212_v21, %v888_v52 }
 0x252   : > { %v877_v51 = vsel %vm876_vm1, %v1214_v31, %v873_v41  ;;  %v897_v10 = vsel %vm894_vm6, %v896_v48, %v892_v5 }
 0x253   : > { %v882_v27 = vsel %vm879_vm2, %v881_v45, %v877_v51 }
 0x254   : > { %901 = vperm.xlu0 %1172, %v882_v27  }
 0x25c   : > { %906 = vperm.xlu0 %1172, %v897_v10  }
 0x264   : > { %919 = vperm.xlu0 %1172, %v916_v49  }
 0x2c6   : > { %v902_v50 = vpop.permute.xlu0 %901 }
 0x2c7   : > { %v909_v26 = vmul.f32 %v902_v50, %v1735_v9  ;;  %v910_v59 = vmul.f32 %v902_v50, %v1737_v24 }
 0x2ce   : > { %v907_v55 = vpop.permute.xlu0 %906 }
 0x2cf   : > { %v911_v43 = vmul.f32 %v907_v55, %v1729_v42  ;;  %v912_v33 = vmul.f32 %v907_v55, %v1731_v40  ;;  %v956_v42 = vld.sshfl [vmem:[#allocation1 + $0x8] sm:$0xff pattern:$0x75316420] }
 0x2d1   : > { %v913_v34 = vpack.c.bf16 %v911_v43, %v909_v26  ;;  %v914_v56 = vpack.c.bf16 %v912_v33, %v910_v59 }
 0x2d3   : > { %933 = vmatpush.bf16.msra.mxu2 %v913_v34  ;;  %946 = vmatpush.bf16.msra.mxu3 %v914_v56 }
 0x2d6   : > { %1075 = vmatmul.msk.bf16.vlgmr.msra.gmra.mxu2 %vm922_vm7, %v915_v44  ;;  %1076 = vmatmul.msk.bf16.vlgmr.msra.gmra.mxu3 %vm922_vm7, %v915_v44  ;;  %v920_v9 = vpop.permute.xlu0 %919 }
 0x359   : > { %v935_v24 = vpop.f32.mrf.mxu2  ;;  %v948_v57 = vpop.f32.mrf.mxu3 }
 0x35a   : > { %v936_v40 = vadd.f32 %v935_v24, %v920_v9  ;;  %v949_v4 = vadd.f32 %v948_v57, %v920_v9 }
 0x35c   : > { %v960_v30 = vadd.f32 %v956_v42, %v949_v4  ;;  %v959_v20 = vadd.f32 %v955_v29, %v936_v40 }
 0x35e   : > { %v963_v0 = vrot.slane %v960_v30, 4 }
 0x360   : > { %v965_v58 = vsel %vm964_vm8, %v959_v20, %v963_v0 }
 0x361   : > { %v937_v35 = vpop.f32.mrf.mxu2  ;;  %v950_v62 = vpop.f32.mrf.mxu3  ;;  %967 = vst [vmem:[%s339_s21] sm:$0xff] %v965_v58 }
 0x362   : > { %1257 = shalt.err (!%p1254_p8)
}
 0x363   : > { %1089 = dma.vmem_to_hbm [thread:$0]  (%p1405_p5), %s983_s22, 128, %s985_s23, %s969_s13  }
 0x364 PF: > { %p1101_p9 = scmp.ge.s32.totalorder %s1296_s12, 2  ;;  %s996_s27 = sand.u32 1, %s1284_s30  }
 0x365   : > { %s997_s17 = scalar_lea.sflag [#allocation3], %s996_s27 }
 0x366   : > { %p1096_p10 = pnand %p1101_p9, %p1409_p6 }
 0x368   : > { %p1097_p11 = pneg %p1096_p10 }
 0x36a   : > { %1279 = dma.done.wait (%p1097_p11), %s997_s17, 128  }
 0x36b   : > { %1281 = vsyncadd (%p1097_p11), %s997_s17, 4294967168  ;;  %p20_p12 = scmp.ge.s32.totalorder %s1392_s15, 4   ;;  %s1799_s30 = smov %s1288_s10 }
 0x36c   : > { %s1800_s10 = smov %s1292_s11  ;;  %s1801_s11 = smov %s1403_s18 }
 0x36d   : > { %s1802_s12 = smov %s1392_s15  ;;  %22 = sbr.rel (!%p20_p12) target bundleno = 4 (0x4), region = 96 }
 0x372   :  { %1003 = vsyncpa [#allocation3], 1 }
 0x373   :  { %1005 = vsyncpa [#allocation3 + $0x1], 1 }
 0x374   :  { %1006 = vsyncpa [#allocation4], 1 }
 0x375   :  { %1008 = vsyncpa [#allocation4 + $0x1], 1 }

</bundles_post_ra>
